<compile_context>
chip_gen: v5e
topology: v5e:2x2
jax: 0.10.0
libtpu: 0.0.40
codegen_flags: <defaults>
</compile_context>

<pallas_src>
import functools

import jax
import jax.numpy as jnp
from jax import lax
from jax.experimental import pallas as pl
from jax.experimental.pallas import tpu as pltpu


def _round_up(v, m):
    return ((v + m - 1) // m) * m


# ----------------------------------------------------------------------------
# Fused kernel: one grid step = one batch element x one output depth plane.
#   conv1 (k=2, s=1) + bias + PReLU + conv2 (k=2, s=2 on this even plane) + bias
# ----------------------------------------------------------------------------
def _down_conv_block_kernel(x_ref, w1_ref, b1_ref, a1_ref, w2_ref, b2_ref,
                            o_ref, xs_ref, ys_ref, *,
                            offs, cin_p, cout, ly, lw, hw):
    # Flat column of input depth plane 2*d2 (multiple of 2*H*W -> lane aligned).
    base = pl.multiple_of(pl.program_id(1) * (2 * hw), 2 * hw)

    # One aligned dynamic window load per step; all tap shifts below are static.
    xwin = x_ref[0, :, pl.ds(base, lw)].astype(jnp.float32)      # (cin_p, lw)

    # ---- conv1: build stacked (8*cin_p, ly) operand once, single K=64 dot ----
    for k, off in enumerate(offs):
        xs_ref[k * cin_p:(k + 1) * cin_p, :] = xwin[:, off:off + ly]

    y = jnp.dot(w1_ref[...], xs_ref[...],
                preferred_element_type=jnp.float32)               # (cout, ly)
    y = y + b1_ref[...]                                           # (cout, 1) bcast
    y = jnp.where(y >= 0.0, y, a1_ref[...] * y)                   # per-channel PReLU

    # ---- conv2 (down) on even depth plane only: stacked operand + single dot -
    for k, off in enumerate(offs):
        ys_ref[k * cout:(k + 1) * cout, :] = y[:, off:off + hw]

    z = jnp.dot(w2_ref[...], ys_ref[...],
                preferred_element_type=jnp.float32) + b2_ref[...]  # (cout, hw)
    o_ref[0] = z.astype(o_ref.dtype)


# ----------------------------------------------------------------------------
# DownConvBlock forward (NCDHW in, NCDHW out — matches the PyTorch module).
# ----------------------------------------------------------------------------
def down_conv_block(x_ncdhw, params):
    w1, b1, alpha, w2, b2 = (params["w1"], params["b1"], params["alpha"],
                             params["w2"], params["b2"])
    N, Cin, D, H, W = x_ncdhw.shape
    Cout = w1.shape[0]
    HW, L = H * W, D * H * W

    # conv1 / conv2 output spatial extents.
    D1, H1, W1 = D - 1, H - 1, W - 1
    D2 = (D1 - 2) // 2 + 1
    H2 = (H1 - 2) // 2 + 1
    W2 = (W1 - 2) // 2 + 1

    # Flat-grid lane offsets of the 8 taps of a k=2 3-D conv (kd, kh, kw order).
    offs = tuple(kd * HW + kh * W + kw
                 for kd in (0, 1) for kh in (0, 1) for kw in (0, 1))
    max_off = offs[-1]

    # Per-step column extents: conv2 is evaluated densely over one plane's HW
    # columns; conv1 needs those plus the conv2 tap halo; the x window adds one
    # more halo on top.  Everything is rounded to lane multiples.
    assert HW % 128 == 0, "H*W must be a lane multiple for the lane-dense output"
    ly = _round_up(HW + max_off, 128)          # conv1 columns per step
    lw = _round_up(ly + max_off, 128)          # x window per step
    lx = _round_up(max(L, 2 * HW * (D2 - 1) + lw), 128)
    assert 2 * HW * (D2 - 1) + lw <= lx        # last plane's window stays in-bounds
    assert 2 * (H2 - 1) * W + 2 * (W2 - 1) < HW  # kept z columns covered per plane

    # Channel-leading flat input (free reshape of NCDHW), channels padded to a
    # sublane multiple, columns zero-padded for the halo; stored as bf16 in HBM
    # to halve the input DMA (slabs/accumulation stay f32 inside the kernel).
    cin_p = _round_up(Cin, 8)
    x_flat = jnp.pad(x_ncdhw.reshape(N, Cin, L),
                     ((0, 0), (0, cin_p - Cin), (0, lx - L))).astype(jnp.bfloat16)

    # Weights with the 8 taps stacked along the contraction axis, matching the
    # row layout of the in-kernel xs / ys slabs: column index = tap*ch + ch.
    w1_flat = jnp.transpose(w1, (0, 2, 3, 4, 1)).reshape(Cout, 8, Cin)
    w1_flat = jnp.pad(w1_flat, ((0, 0), (0, 0), (0, cin_p - Cin)))
    w1_flat = w1_flat.reshape(Cout, 8 * cin_p)
    w2_flat = jnp.transpose(w2, (0, 2, 3, 4, 1)).reshape(Cout, 8 * Cout)

    kernel = functools.partial(_down_conv_block_kernel, offs=offs,
                               cin_p=cin_p, cout=Cout, ly=ly, lw=lw, hw=HW)

    z_planes = pl.pallas_call(
        kernel,
        out_shape=jax.ShapeDtypeStruct((N, Cout, D2 * HW), jnp.float32),
        grid=(N, D2),
        in_specs=[
            # x slab: block index ignores d2 -> fetched once per batch, resident.
            pl.BlockSpec((1, cin_p, lx), lambda n, d: (n, 0, 0)),
            pl.BlockSpec((Cout, 8 * cin_p), lambda n, d: (0, 0)),
            pl.BlockSpec((Cout, 1), lambda n, d: (0, 0)),
            pl.BlockSpec((Cout, 1), lambda n, d: (0, 0)),
            pl.BlockSpec((Cout, 8 * Cout), lambda n, d: (0, 0)),
            pl.BlockSpec((Cout, 1), lambda n, d: (0, 0)),
        ],
        out_specs=pl.BlockSpec((1, Cout, HW), lambda n, d: (n, 0, d)),
        scratch_shapes=[
            pltpu.VMEM((8 * cin_p, ly), jnp.float32),   # conv1 stacked operand
            pltpu.VMEM((8 * Cout, HW), jnp.float32),    # conv2 stacked operand
        ],
        compiler_params=pltpu.CompilerParams(
            dimension_semantics=("parallel", "parallel"),
            vmem_limit_bytes=32 * 1024 * 1024,
        ),
    )(x_flat, w1_flat, b1.reshape(Cout, 1), alpha.reshape(Cout, 1),
      w2_flat, b2.reshape(Cout, 1))

    # Depth stride-2 was done in-kernel; only the cheap, aligned h/w stride-2
    # valid-region slice is left to XLA.  Result is already NC(D2)HW ordered.
    z = z_planes.reshape(N, Cout, D2, H, W)
    return z[:, :, :, 0:2 * H2 - 1:2, 0:2 * W2 - 1:2]


# ----------------------------------------------------------------------------
# Pure-JAX reference (lax conv) for a correctness check.
# ----------------------------------------------------------------------------
def _ref_forward(x, params):
    w1, b1, alpha, w2, b2 = (params["w1"], params["b1"], params["alpha"],
                             params["w2"], params["b2"])
    dn = lax.conv_dimension_numbers(x.shape, w1.shape,
                                    ("NCDHW", "OIDHW", "NCDHW"))
    y = lax.conv_general_dilated(x, w1, (1, 1, 1), "VALID",
                                 dimension_numbers=dn)
    y = y + b1.reshape(1, -1, 1, 1, 1)
    y = jnp.where(y >= 0, y, alpha.reshape(1, -1, 1, 1, 1) * y)
    z = lax.conv_general_dilated(y, w2, (2, 2, 2), "VALID",
                                 dimension_numbers=dn)
    return z + b2.reshape(1, -1, 1, 1, 1)


if __name__ == "__main__":
    # Small shapes implied by the module: batch=2, Cin=4, Cout=8, spatial=16.
    N, Cin, Cout, S = 2, 4, 8, 16

    key = jax.random.PRNGKey(0)
    kx, k1, kb1, k2, kb2 = jax.random.split(key, 5)

    x = jax.random.normal(kx, (N, Cin, S, S, S), dtype=jnp.float32)

    params = {
        # Conv3d(Cin, Cout, k=2): weight (Cout, Cin, 2, 2, 2), bias (Cout,)
        "w1": jax.random.normal(k1, (Cout, Cin, 2, 2, 2), jnp.float32) * 0.2,
        "b1": jax.random.normal(kb1, (Cout,), jnp.float32) * 0.1,
        # PReLU(num_parameters=Cout): default init 0.25
        "alpha": jnp.full((Cout,), 0.25, jnp.float32),
        # Conv3d(Cout, Cout, k=2, stride=2)
        "w2": jax.random.normal(k2, (Cout, Cout, 2, 2, 2), jnp.float32) * 0.2,
        "b2": jax.random.normal(kb2, (Cout,), jnp.float32) * 0.1,
    }

    out = jax.block_until_ready(jax.jit(down_conv_block)(x, params))
    assert out.shape == (N, Cout, 7, 7, 7), out.shape

    ref = jax.block_until_ready(_ref_forward(x, params))
    assert jnp.allclose(out, ref, rtol=2e-2, atol=2e-2), (
        float(jnp.max(jnp.abs(out - ref))))

    print("KERNEL_OK")
</pallas_src>

<mosaic_0001>
module attributes {stable_mosaic.version = 11 : i64} {
  func.func @_down_conv_block_kernel(%arg0: i32, %arg1: i32, %arg2: memref<1x8x4096xbf16, #tpu.memory_space<vmem>>, %arg3: memref<8x64xf32, #tpu.memory_space<vmem>>, %arg4: memref<8x1xf32, #tpu.memory_space<vmem>>, %arg5: memref<8x1xf32, #tpu.memory_space<vmem>>, %arg6: memref<8x64xf32, #tpu.memory_space<vmem>>, %arg7: memref<8x1xf32, #tpu.memory_space<vmem>>, %arg8: memref<1x8x256xf32, #tpu.memory_space<vmem>>, %arg9: memref<64x640xf32, #tpu.memory_space<vmem>>, %arg10: memref<64x256xf32, #tpu.memory_space<vmem>>) attributes {dimension_semantics = [#tpu.dimension_semantics<parallel>, #tpu.dimension_semantics<parallel>], iteration_bounds = array<i64: 2, 7>, scalar_prefetch = 0 : i64, scratch_operands = 2 : i64, tpu.core_type = #tpu.core_type<tc>, window_params = [{transform_indices = @transform_0, window_bounds = array<i64: 1, 8, 4096>}, {pipeline_mode = #tpu.pipeline_mode<synchronous>, transform_indices = @transform_1, window_bounds = array<i64: 8, 64>}, {pipeline_mode = #tpu.pipeline_mode<synchronous>, transform_indices = @transform_2, window_bounds = array<i64: 8, 1>}, {pipeline_mode = #tpu.pipeline_mode<synchronous>, transform_indices = @transform_3, window_bounds = array<i64: 8, 1>}, {pipeline_mode = #tpu.pipeline_mode<synchronous>, transform_indices = @transform_4, window_bounds = array<i64: 8, 64>}, {pipeline_mode = #tpu.pipeline_mode<synchronous>, transform_indices = @transform_5, window_bounds = array<i64: 8, 1>}, {transform_indices = @transform_6, window_bounds = array<i64: 1, 8, 256>}]} {
    %c512_i32 = arith.constant 512 : i32
    %0 = arith.muli %arg1, %c512_i32 : i32
    %1 = tpu.assume_multiple %0, 512 : i32
    %c0 = arith.constant 0 : index
    %c0_0 = arith.constant 0 : index
    %2 = arith.index_cast %1 : i32 to index
    %3 = vector.load %arg2[%c0, %c0_0, %2] : memref<1x8x4096xbf16, #tpu.memory_space<vmem>>, vector<1x8x1024xbf16>
    %4 = vector.shape_cast %3 : vector<1x8x1024xbf16> to vector<8x1024xbf16>
    %5 = arith.extf %4 : vector<8x1024xbf16> to vector<8x1024xf32>
    %6 = vector.extract_strided_slice %5 {offsets = [0, 0], sizes = [8, 640], strides = [1, 1]} : vector<8x1024xf32> to vector<8x640xf32>
    %c0_1 = arith.constant 0 : index
    %c0_2 = arith.constant 0 : index
    %7 = vector.load %arg9[%c0_1, %c0_2] : memref<64x640xf32, #tpu.memory_space<vmem>>, vector<8x640xf32>
    tpu.vector_store %arg9[%c0_1, %c0_2], %6 {strides = array<i32>} : memref<64x640xf32, #tpu.memory_space<vmem>>, vector<8x640xf32>,
    %8 = vector.extract_strided_slice %5 {offsets = [0, 1], sizes = [8, 640], strides = [1, 1]} : vector<8x1024xf32> to vector<8x640xf32>
    %c8 = arith.constant 8 : index
    %c0_3 = arith.constant 0 : index
    %9 = vector.load %arg9[%c8, %c0_3] : memref<64x640xf32, #tpu.memory_space<vmem>>, vector<8x640xf32>
    tpu.vector_store %arg9[%c8, %c0_3], %8 {strides = array<i32>} : memref<64x640xf32, #tpu.memory_space<vmem>>, vector<8x640xf32>,
    %10 = vector.extract_strided_slice %5 {offsets = [0, 16], sizes = [8, 640], strides = [1, 1]} : vector<8x1024xf32> to vector<8x640xf32>
    %c16 = arith.constant 16 : index
    %c0_4 = arith.constant 0 : index
    %11 = vector.load %arg9[%c16, %c0_4] : memref<64x640xf32, #tpu.memory_space<vmem>>, vector<8x640xf32>
    tpu.vector_store %arg9[%c16, %c0_4], %10 {strides = array<i32>} : memref<64x640xf32, #tpu.memory_space<vmem>>, vector<8x640xf32>,
    %12 = vector.extract_strided_slice %5 {offsets = [0, 17], sizes = [8, 640], strides = [1, 1]} : vector<8x1024xf32> to vector<8x640xf32>
    %c24 = arith.constant 24 : index
    %c0_5 = arith.constant 0 : index
    %13 = vector.load %arg9[%c24, %c0_5] : memref<64x640xf32, #tpu.memory_space<vmem>>, vector<8x640xf32>
    tpu.vector_store %arg9[%c24, %c0_5], %12 {strides = array<i32>} : memref<64x640xf32, #tpu.memory_space<vmem>>, vector<8x640xf32>,
    %14 = vector.extract_strided_slice %5 {offsets = [0, 256], sizes = [8, 640], strides = [1, 1]} : vector<8x1024xf32> to vector<8x640xf32>
    %c32 = arith.constant 32 : index
    %c0_6 = arith.constant 0 : index
    %15 = vector.load %arg9[%c32, %c0_6] : memref<64x640xf32, #tpu.memory_space<vmem>>, vector<8x640xf32>
    tpu.vector_store %arg9[%c32, %c0_6], %14 {strides = array<i32>} : memref<64x640xf32, #tpu.memory_space<vmem>>, vector<8x640xf32>,
    %16 = vector.extract_strided_slice %5 {offsets = [0, 257], sizes = [8, 640], strides = [1, 1]} : vector<8x1024xf32> to vector<8x640xf32>
    %c40 = arith.constant 40 : index
    %c0_7 = arith.constant 0 : index
    %17 = vector.load %arg9[%c40, %c0_7] : memref<64x640xf32, #tpu.memory_space<vmem>>, vector<8x640xf32>
    tpu.vector_store %arg9[%c40, %c0_7], %16 {strides = array<i32>} : memref<64x640xf32, #tpu.memory_space<vmem>>, vector<8x640xf32>,
    %18 = vector.extract_strided_slice %5 {offsets = [0, 272], sizes = [8, 640], strides = [1, 1]} : vector<8x1024xf32> to vector<8x640xf32>
    %c48 = arith.constant 48 : index
    %c0_8 = arith.constant 0 : index
    %19 = vector.load %arg9[%c48, %c0_8] : memref<64x640xf32, #tpu.memory_space<vmem>>, vector<8x640xf32>
    tpu.vector_store %arg9[%c48, %c0_8], %18 {strides = array<i32>} : memref<64x640xf32, #tpu.memory_space<vmem>>, vector<8x640xf32>,
    %20 = vector.extract_strided_slice %5 {offsets = [0, 273], sizes = [8, 640], strides = [1, 1]} : vector<8x1024xf32> to vector<8x640xf32>
    %c56 = arith.constant 56 : index
    %c0_9 = arith.constant 0 : index
    %21 = vector.load %arg9[%c56, %c0_9] : memref<64x640xf32, #tpu.memory_space<vmem>>, vector<8x640xf32>
    tpu.vector_store %arg9[%c56, %c0_9], %20 {strides = array<i32>} : memref<64x640xf32, #tpu.memory_space<vmem>>, vector<8x640xf32>,
    %c0_10 = arith.constant 0 : index
    %c0_11 = arith.constant 0 : index
    %22 = vector.load %arg3[%c0_10, %c0_11] : memref<8x64xf32, #tpu.memory_space<vmem>>, vector<8x64xf32>
    %c0_12 = arith.constant 0 : index
    %c0_13 = arith.constant 0 : index
    %23 = vector.load %arg9[%c0_12, %c0_13] : memref<64x640xf32, #tpu.memory_space<vmem>>, vector<64x640xf32>
    %cst = arith.constant dense<0.000000e+00> : vector<8x640xf32>
    %24 = tpu.matmul %22, %23, %cst {dimension_numbers = #tpu.dot_dimension_numbers<[1], [0], [0], [1], [0, 0, 1, 1], [], []>} : vector<8x64xf32>, vector<64x640xf32>, vector<8x640xf32> -> vector<8x640xf32>
    %c0_14 = arith.constant 0 : index
    %c0_15 = arith.constant 0 : index
    %25 = vector.load %arg4[%c0_14, %c0_15] : memref<8x1xf32, #tpu.memory_space<vmem>>, vector<8x1xf32>
    %26 = vector.broadcast %25 : vector<8x1xf32> to vector<8x640xf32>
    %27 = arith.addf %24, %26 : vector<8x640xf32>
    %cst_16 = arith.constant 0.000000e+00 : f32
    %28 = vector.broadcast %cst_16 : f32 to vector<8x640xf32>
    %29 = arith.cmpf oge, %27, %28 : vector<8x640xf32>
    %c0_17 = arith.constant 0 : index
    %c0_18 = arith.constant 0 : index
    %30 = vector.load %arg5[%c0_17, %c0_18] : memref<8x1xf32, #tpu.memory_space<vmem>>, vector<8x1xf32>
    %31 = vector.broadcast %30 : vector<8x1xf32> to vector<8x640xf32>
    %32 = arith.mulf %31, %27 : vector<8x640xf32>
    %33 = arith.select %29, %27, %32 : vector<8x640xi1>, vector<8x640xf32>
    %34 = vector.extract_strided_slice %33 {offsets = [0, 0], sizes = [8, 256], strides = [1, 1]} : vector<8x640xf32> to vector<8x256xf32>
    %c0_19 = arith.constant 0 : index
    %c0_20 = arith.constant 0 : index
    %35 = vector.load %arg10[%c0_19, %c0_20] : memref<64x256xf32, #tpu.memory_space<vmem>>, vector<8x256xf32>
    tpu.vector_store %arg10[%c0_19, %c0_20], %34 {strides = array<i32>} : memref<64x256xf32, #tpu.memory_space<vmem>>, vector<8x256xf32>,
    %36 = vector.extract_strided_slice %33 {offsets = [0, 1], sizes = [8, 256], strides = [1, 1]} : vector<8x640xf32> to vector<8x256xf32>
    %c8_21 = arith.constant 8 : index
    %c0_22 = arith.constant 0 : index
    %37 = vector.load %arg10[%c8_21, %c0_22] : memref<64x256xf32, #tpu.memory_space<vmem>>, vector<8x256xf32>
    tpu.vector_store %arg10[%c8_21, %c0_22], %36 {strides = array<i32>} : memref<64x256xf32, #tpu.memory_space<vmem>>, vector<8x256xf32>,
    %38 = vector.extract_strided_slice %33 {offsets = [0, 16], sizes = [8, 256], strides = [1, 1]} : vector<8x640xf32> to vector<8x256xf32>
    %c16_23 = arith.constant 16 : index
    %c0_24 = arith.constant 0 : index
    %39 = vector.load %arg10[%c16_23, %c0_24] : memref<64x256xf32, #tpu.memory_space<vmem>>, vector<8x256xf32>
    tpu.vector_store %arg10[%c16_23, %c0_24], %38 {strides = array<i32>} : memref<64x256xf32, #tpu.memory_space<vmem>>, vector<8x256xf32>,
    %40 = vector.extract_strided_slice %33 {offsets = [0, 17], sizes = [8, 256], strides = [1, 1]} : vector<8x640xf32> to vector<8x256xf32>
    %c24_25 = arith.constant 24 : index
    %c0_26 = arith.constant 0 : index
    %41 = vector.load %arg10[%c24_25, %c0_26] : memref<64x256xf32, #tpu.memory_space<vmem>>, vector<8x256xf32>
    tpu.vector_store %arg10[%c24_25, %c0_26], %40 {strides = array<i32>} : memref<64x256xf32, #tpu.memory_space<vmem>>, vector<8x256xf32>,
    %42 = vector.extract_strided_slice %33 {offsets = [0, 256], sizes = [8, 256], strides = [1, 1]} : vector<8x640xf32> to vector<8x256xf32>
    %c32_27 = arith.constant 32 : index
    %c0_28 = arith.constant 0 : index
    %43 = vector.load %arg10[%c32_27, %c0_28] : memref<64x256xf32, #tpu.memory_space<vmem>>, vector<8x256xf32>
    tpu.vector_store %arg10[%c32_27, %c0_28], %42 {strides = array<i32>} : memref<64x256xf32, #tpu.memory_space<vmem>>, vector<8x256xf32>,
    %44 = vector.extract_strided_slice %33 {offsets = [0, 257], sizes = [8, 256], strides = [1, 1]} : vector<8x640xf32> to vector<8x256xf32>
    %c40_29 = arith.constant 40 : index
    %c0_30 = arith.constant 0 : index
    %45 = vector.load %arg10[%c40_29, %c0_30] : memref<64x256xf32, #tpu.memory_space<vmem>>, vector<8x256xf32>
    tpu.vector_store %arg10[%c40_29, %c0_30], %44 {strides = array<i32>} : memref<64x256xf32, #tpu.memory_space<vmem>>, vector<8x256xf32>,
    %46 = vector.extract_strided_slice %33 {offsets = [0, 272], sizes = [8, 256], strides = [1, 1]} : vector<8x640xf32> to vector<8x256xf32>
    %c48_31 = arith.constant 48 : index
    %c0_32 = arith.constant 0 : index
    %47 = vector.load %arg10[%c48_31, %c0_32] : memref<64x256xf32, #tpu.memory_space<vmem>>, vector<8x256xf32>
    tpu.vector_store %arg10[%c48_31, %c0_32], %46 {strides = array<i32>} : memref<64x256xf32, #tpu.memory_space<vmem>>, vector<8x256xf32>,
    %48 = vector.extract_strided_slice %33 {offsets = [0, 273], sizes = [8, 256], strides = [1, 1]} : vector<8x640xf32> to vector<8x256xf32>
    %c56_33 = arith.constant 56 : index
    %c0_34 = arith.constant 0 : index
    %49 = vector.load %arg10[%c56_33, %c0_34] : memref<64x256xf32, #tpu.memory_space<vmem>>, vector<8x256xf32>
    tpu.vector_store %arg10[%c56_33, %c0_34], %48 {strides = array<i32>} : memref<64x256xf32, #tpu.memory_space<vmem>>, vector<8x256xf32>,
    %c0_35 = arith.constant 0 : index
    %c0_36 = arith.constant 0 : index
    %50 = vector.load %arg6[%c0_35, %c0_36] : memref<8x64xf32, #tpu.memory_space<vmem>>, vector<8x64xf32>
    %c0_37 = arith.constant 0 : index
    %c0_38 = arith.constant 0 : index
    %51 = vector.load %arg10[%c0_37, %c0_38] : memref<64x256xf32, #tpu.memory_space<vmem>>, vector<64x256xf32>
    %cst_39 = arith.constant dense<0.000000e+00> : vector<8x256xf32>
    %52 = tpu.matmul %50, %51, %cst_39 {dimension_numbers = #tpu.dot_dimension_numbers<[1], [0], [0], [1], [0, 0, 1, 1], [], []>} : vector<8x64xf32>, vector<64x256xf32>, vector<8x256xf32> -> vector<8x256xf32>
    %c0_40 = arith.constant 0 : index
    %c0_41 = arith.constant 0 : index
    %53 = vector.load %arg7[%c0_40, %c0_41] : memref<8x1xf32, #tpu.memory_space<vmem>>, vector<8x1xf32>
    %54 = vector.broadcast %53 : vector<8x1xf32> to vector<8x256xf32>
    %55 = arith.addf %52, %54 : vector<8x256xf32>
    %c0_42 = arith.constant 0 : index
    %c0_43 = arith.constant 0 : index
    %c0_44 = arith.constant 0 : index
    %56 = vector.load %arg8[%c0_42, %c0_43, %c0_44] : memref<1x8x256xf32, #tpu.memory_space<vmem>>, vector<1x8x256xf32>
    %57 = vector.shape_cast %56 : vector<1x8x256xf32> to vector<8x256xf32>
    %58 = vector.shape_cast %55 : vector<8x256xf32> to vector<1x8x256xf32>
    tpu.vector_store %arg8[%c0_42, %c0_43, %c0_44], %58 {strides = array<i32>} : memref<1x8x256xf32, #tpu.memory_space<vmem>>, vector<1x8x256xf32>,
    return
  }
  func.func @transform_0(%arg0: i32, %arg1: i32) -> (i32, i32, i32) {
    %c0_i32 = arith.constant 0 : i32
    %c0_i32_0 = arith.constant 0 : i32
    %c0_i32_1 = arith.constant 0 : i32
    return %arg0, %c0_i32, %c0_i32_0 : i32, i32, i32
  }
  func.func @transform_1(%arg0: i32, %arg1: i32) -> (i32, i32) {
    %c0_i32 = arith.constant 0 : i32
    %c0_i32_0 = arith.constant 0 : i32
    %c0_i32_1 = arith.constant 0 : i32
    return %c0_i32, %c0_i32_0 : i32, i32
  }
  func.func @transform_2(%arg0: i32, %arg1: i32) -> (i32, i32) {
    %c0_i32 = arith.constant 0 : i32
    %c0_i32_0 = arith.constant 0 : i32
    %c0_i32_1 = arith.constant 0 : i32
    return %c0_i32, %c0_i32_0 : i32, i32
  }
  func.func @transform_3(%arg0: i32, %arg1: i32) -> (i32, i32) {
    %c0_i32 = arith.constant 0 : i32
    %c0_i32_0 = arith.constant 0 : i32
    %c0_i32_1 = arith.constant 0 : i32
    return %c0_i32, %c0_i32_0 : i32, i32
  }
  func.func @transform_4(%arg0: i32, %arg1: i32) -> (i32, i32) {
    %c0_i32 = arith.constant 0 : i32
    %c0_i32_0 = arith.constant 0 : i32
    %c0_i32_1 = arith.constant 0 : i32
    return %c0_i32, %c0_i32_0 : i32, i32
  }
  func.func @transform_5(%arg0: i32, %arg1: i32) -> (i32, i32) {
    %c0_i32 = arith.constant 0 : i32
    %c0_i32_0 = arith.constant 0 : i32
    %c0_i32_1 = arith.constant 0 : i32
    return %c0_i32, %c0_i32_0 : i32, i32
  }
  func.func @transform_6(%arg0: i32, %arg1: i32) -> (i32, i32, i32) {
    %c0_i32 = arith.constant 0 : i32
    %c0_i32_0 = arith.constant 0 : i32
    return %arg0, %c0_i32, %arg1 : i32, i32, i32
  }
}

</mosaic_0001>

<bundles_post_ra>
// kernel: down_conv_block.1
= control target key start
LH: loop header
LB: loop body
LE: loop exit
PB: predicated region body
PF: predicated region fallthrough
CT: control target
= control target key end

     0   :  { %s1071_s21 = smov 0   ;;  %s1073_s22 = smov 0   ;;  %s1313_s0 = inlined_call_operand.vmem [shape: bf16[2,8,4096], index: 0, kind: input, shape index: {}]   ;;  %s1314_s1 = inlined_call_operand.vmem [shape: f32[8,64], index: 1, kind: input, shape index: {}]   ;;  %s1315_s2 = inlined_call_operand.vmem [shape: f32[8,1], index: 2, kind: input, shape index: {}]   ;;  %s1316_s3 = inlined_call_operand.vmem [shape: f32[8,1], index: 3, kind: input, shape index: {}]   ;;  %s1317_s4 = inlined_call_operand.vmem [shape: f32[8,64], index: 4, kind: input, shape index: {}]   ;;  %s1318_s5 = inlined_call_operand.vmem [shape: f32[8,1], index: 5, kind: input, shape index: {}]   ;;  %s1319_s6 = inlined_call_operand.vmem [shape: f32[2,8,1792], index: 6, kind: output, shape index: {}]  }
   0x1   :  { %s1075_s23 = smov 0   ;;  %s1077_s24 = smov 0  }
   0x2   :  { %s1079_s25 = smov 0  }
   0x3 LB: > { %s25_s26 = sadd.s32 1, %s1022_s23  ;;  %s28_s27 = sadd.s32 1, %s1026_s24  ;;  %s1030_s25 = sphi %s1079_s25, %s16_s25   ;;  %s1026_s24 = sphi %s1077_s24, %s1323_s24   ;;  %s1022_s23 = sphi %s1075_s23, %s1322_s23   ;;  %s1018_s22 = sphi %s1073_s22, %s1321_s22   ;;  %s1014_s21 = sphi %s1071_s21, %s1320_s21  }
   0x4   : > { %p26_p0 = scmp.ge.s32.totalorder %s25_s26, 7  ;;  %p838_p1 = scmp.ge.s32.totalorder %s1030_s25, 1 }
   0x5   : > { %p226_p2 = scmp.lt.s32.totalorder %s1030_s25, 15 }
   0x6   : > { %s1325_s26 = smov (%p26_p0, %s25_s26), 0  ;;  %s1327_s27 = smov (!%p26_p0, %s28_s27), %s1026_s24 }
   0x7   : > { %p227_p3 = pnand %p838_p1, %p226_p2  ;;  %p30_p4 = scmp.ge.s32.totalorder %s1327_s27, 2 }
   0x8   : > { %p260_p5 = scmp.lt.s32.totalorder (!%p227_p3), %s1018_s22, 1  ;;  %s843_s28 = sshll.u32 (!%p227_p3), %s1014_s21, 9 }
   0x9   : > { %s1329_s27 = smov (%p30_p4, %s1327_s27), 0  ;;  %230 = sbr.rel (%p227_p3) target bundleno = 585 (0x249), region = 44 }
   0xa   : > { %s276_s29 = sshra.s32 (!%p227_p3), %s843_s28, 7  ;;  %s1032_s12 = smov (!%p227_p3), 111  }
   0xb   : > { %s844_s30 = sshll.u32 (!%p227_p3), %s276_s29, 2  ;;  %s1033_s13 = smov (!%p227_p3), 112  }
   0xc   : > { %s1034_s14 = smov (!%p227_p3), 127   ;;  %s841_s8 = sshll.u32 (!%p227_p3), %s1014_s21, 1 }
   0xd   : > { %p268_p6 = scmp.lt.s32.totalorder (!%p227_p3), %s841_s8, 13 }
   0xe   : > { %s1331_s22 = smov (!%p260_p5, %s1018_s22), 1  ;;  %vm371_vm0 = vcmask 908288   ;;  %vm343_vm1 = vcmask 916480   ;;  %vm315_vm2 = vcmask 1039360   ;;  %v1035_v41 = vmov 0   ;;  %v474_v42 = vld [vmem:[%s1315_s2] sm:$0xff] }
   0xf   : > { %s854_s7 = sshll.u32 %s1331_s22, 7  ;;  %960 = vset.pattern.permute.xlu0 %v1035_v41  ;;  %v589_v43 = vld [vmem:[%s1316_s3] sm:$0xff]  ;;  %961 = vset.pattern.permute.xlu1 %v1035_v41  ;;  %vm480_vm3 = vcmask 523264   ;;  %s855_s9 = smul.u32 14, %s1331_s22 }
  0x10   : > { %s264_s10 = scalar_lea.vmem %s1313_s0, %s854_s7  ;;  %s1333_s8 = smov (!%p268_p6, %s841_s8), 13 }
  0x11   : > { %s279_s11 = scalar_lea.vmem %s264_s10, %s844_s30  ;;  %s271_s10 = sadd.s32 %s855_s9, %s1333_s8 }
  0x12   : > { %v282_v0 = vld [vmem:[%s279_s11 + $0x10] sm:$0xff]  ;;  %v1110_v1 = vld [vmem:[%s279_s11 + $0x18] sm:$0xff]  ;;  %v281_v2 = vld [vmem:[%s279_s11 + $0x8] sm:$0xff] }
  0x13   : > { %v289_v3 = vunpack.c.h.bf16 %v282_v0  ;;  %v290_v4 = vunpack.c.l.bf16 %v1110_v1  ;;  %v1113_v5 = vunpack.c.l.bf16 %v281_v2  ;;  %v1115_v6 = vunpack.c.h.bf16 %v281_v2  ;;  %v1124_v9 = vld [vmem:[%s279_s11] sm:$0xff]  ;;  %s842_s11 = sshll.u32 %s271_s10, 3 }
  0x14   : > { %v1126_v10 = vunpack.c.l.bf16 %v282_v0  ;;  %v291_v11 = vunpack.c.h.bf16 %v1110_v1  ;;  %v284_v12 = vunpack.c.l.bf16 %v1124_v9  ;;  %v285_v13 = vunpack.c.h.bf16 %v1124_v9 }
  0x15   : > { %v910_v7 = vpack.i.bf16 %v290_v4, %v289_v3  ;;  %v900_v8 = vpack.i.bf16 %v1115_v6, %v1113_v5 }
  0x16   : > { %v935_v14 = vpack.i.bf16 %v291_v11, %v1126_v10  ;;  %v940_v15 = vpack.i.bf16 %v285_v13, %v284_v12 }
  0x17   : > { %911 = vrot.lane.b32.xlu1 %v910_v7, %s1032_s12  ;;  %921 = vrot.lane.b32.xlu2 %v910_v7, %s1033_s13 }
  0x18   : > { %901 = vrot.lane.b32.xlu0 %v900_v8, %s1032_s12 }
  0x1f   : > { %916 = vrot.lane.b32.xlu1 %v900_v8, %s1034_s14  ;;  %926 = vrot.lane.b32.xlu2 %v910_v7, %s1034_s14 }
  0x20   : > { %906 = vrot.lane.b32.xlu0 %v900_v8, %s1033_s13 }
  0x27   : > { %936 = vrot.lane.b32.xlu1 %v935_v14, %s1032_s12  ;;  %941 = vrot.lane.b32.xlu2 %v940_v15, %s1033_s13 }
  0x28   : > { %931 = vrot.lane.b32.xlu0 %v940_v15, %s1032_s12 }
  0x2f   : > { %951 = vrot.lane.b32.xlu1 %v940_v15, %s1034_s14  ;;  %956 = vrot.lane.b32.xlu2 %v935_v14, %s1034_s14 }
  0x30   : > { %946 = vrot.lane.b32.xlu0 %v935_v14, %s1033_s13 }
  0x37   : > { %592 = vperm.xlu1 %961, %v589_v43  }
  0x38   : > { %477 = vperm.xlu0 %960, %v474_v42  }
  0x71   : > { %v1145_v16 = vpop.permute.xlu2 %921 }
  0x72   : > { %v924_v17 = vunpack.i.h.bf16 %v1145_v16  ;;  %v923_v18 = vunpack.i.l.bf16 %v1145_v16 }
  0x74   : > { %v411_v29 = vsel %vm343_vm1, %v923_v18, %v924_v17 }
  0x79   : > { %v1149_v19 = vpop.permute.xlu2 %926 }
  0x7a   : > { %v929_v21 = vunpack.i.h.bf16 %v1149_v19  ;;  %v928_v22 = vunpack.i.l.bf16 %v1149_v19 }
  0x7c   : > { %v398_v31 = vsel %vm315_vm2, %v928_v22, %v929_v21 }
  0x81   : > { %v1193_v39 = vpop.permute.xlu2 %941 }
  0x82   : > { %v943_v44 = vunpack.i.l.bf16 %v1193_v39  ;;  %v944_v48 = vunpack.i.h.bf16 %v1193_v39 }
  0x84   : > { %v344_v54 = vsel %vm343_vm1, %v943_v44, %v944_v48 }
  0x89   : > { %v1151_v20 = vpop.permute.xlu1 %911  ;;  %v957_v55 = vpop.permute.xlu2 %956 }
  0x8a   : > { %v914_v23 = vunpack.i.h.bf16 %v1151_v20  ;;  %v913_v24 = vunpack.i.l.bf16 %v1151_v20  ;;  %v1157_v25 = vpop.permute.xlu0 %901  ;;  %v958_v60 = vunpack.i.l.bf16 %v957_v55  ;;  %v959_v11 = vunpack.i.h.bf16 %v957_v55 }
  0x8b   : > { %v904_v26 = vunpack.i.h.bf16 %v1157_v25  ;;  %v903_v27 = vunpack.i.l.bf16 %v1157_v25 }
  0x8c   : > { %v424_v28 = vsel %vm371_vm0, %v913_v24, %v914_v23  ;;  %v320_v8 = vsel %vm315_vm2, %v958_v60, %v928_v22  ;;  %v399_v16 = vsel %vm315_vm2, %v929_v21, %v959_v11 }
  0x8d   : > { %552 = vmatpush.msra.mxu3 %v424_v28  ;;  %v1172_v30 = vsel %vm371_vm0, %v903_v27, %v904_v26 }
  0x8e   : > { %492 = vmatpush.msra.mxu0 %v1172_v30 }
  0x8f   : > { %553 = vmatpush.msra.mxu3 %v411_v29 }
  0x91   : > { %v1180_v32 = vpop.permute.xlu1 %916  ;;  %554 = vmatpush.msra.mxu3 %v398_v31 }
  0x92   : > { %v1182_v33 = vpop.permute.xlu0 %906  ;;  %v919_v34 = vunpack.i.h.bf16 %v1180_v32  ;;  %v918_v35 = vunpack.i.l.bf16 %v1180_v32 }
  0x93   : > { %v909_v36 = vunpack.i.h.bf16 %v1182_v33  ;;  %v908_v37 = vunpack.i.l.bf16 %v1182_v33  ;;  %555 = vmatpush.msra.mxu3 %v289_v3 }
  0x94   : > { %v1199_v40 = vsel %vm315_vm2, %v918_v35, %v919_v34  ;;  %v319_v7 = vsel %vm315_vm2, %v919_v34, %v958_v60 }
  0x95   : > { %v1191_v38 = vsel %vm343_vm1, %v908_v37, %v909_v36 }
  0x96   : > { %493 = vmatpush.msra.mxu0 %v1191_v38 }
  0x98   : > { %494 = vmatpush.msra.mxu0 %v1199_v40 }
  0x99   : > { %v937_v45 = vpop.permute.xlu1 %936 }
  0x9a   : > { %v938_v46 = vunpack.i.l.bf16 %v937_v45  ;;  %v932_v47 = vpop.permute.xlu0 %931  ;;  %495 = vmatpush.msra.mxu0 %v1113_v5  ;;  %v939_v62 = vunpack.i.h.bf16 %v937_v45 }
  0x9b   : > { %v934_v49 = vunpack.i.h.bf16 %v932_v47  ;;  %v933_v50 = vunpack.i.l.bf16 %v932_v47 }
  0x9c   : > { %v375_v51 = vsel %vm371_vm0, %v904_v26, %v938_v46  ;;  %v376_v52 = vsel %vm371_vm0, %v938_v46, %v913_v24  ;;  %v425_v14 = vsel %vm371_vm0, %v914_v23, %v939_v62 }
  0x9d   : > { %512 = vmatpush.msra.mxu1 %v375_v51  ;;  %532 = vmatpush.msra.mxu2 %v376_v52  ;;  %v372_v53 = vsel %vm371_vm0, %v933_v50, %v934_v49  ;;  %v373_v15 = vsel %vm371_vm0, %v934_v49, %v903_v27 }
  0x9e   : > { %556 = vmatpush.msra.mxu3 %v375_v51  ;;  %496 = vmatpush.msra.mxu0 %v372_v53 }
  0xa0   : > { %497 = vmatpush.msra.mxu0 %v344_v54 }
  0xa1   : > { %v952_v56 = vpop.permute.xlu1 %951 }
  0xa2   : > { %v954_v57 = vunpack.i.h.bf16 %v952_v56  ;;  %v953_v58 = vunpack.i.l.bf16 %v952_v56  ;;  %v947_v59 = vpop.permute.xlu0 %946 }
  0xa3   : > { %v948_v61 = vunpack.i.l.bf16 %v947_v59  ;;  %v949_v3 = vunpack.i.h.bf16 %v947_v59 }
  0xa4   : > { %v316_v63 = vsel %vm315_vm2, %v953_v58, %v954_v57 }
  0xa5   : > { %498 = vmatpush.msra.mxu0 %v316_v63  ;;  %v347_v0 = vsel %vm343_vm1, %v909_v36, %v948_v61  ;;  %v348_v2 = vsel %vm343_vm1, %v948_v61, %v923_v18  ;;  %v433_v18 = vld [vmem:[%s1314_s1] sm:$0xff] }
  0xa6   : > { %513 = vmatpush.msra.mxu1 %v347_v0  ;;  %533 = vmatpush.msra.mxu2 %v348_v2 }
  0xa7   : > { %557 = vmatpush.msra.mxu3 %v347_v0  ;;  %499 = vmatpush.msra.mxu0 %v284_v12  ;;  %v412_v12 = vsel %vm343_vm1, %v924_v17, %v949_v3  ;;  %v345_v17 = vsel %vm343_vm1, %v944_v48, %v908_v37  ;;  %v697_v37 = vld [vmem:[%s1318_s5] sm:$0xff] }
  0xa8   : > { %514 = vmatpush.msra.mxu1 %v319_v7  ;;  %534 = vmatpush.msra.mxu2 %v320_v8  ;;  %v680_v3 = vld [vmem:[%s1317_s4] sm:$0xff] }
  0xa9   : > { %558 = vmatpush.msra.mxu3 %v319_v7  ;;  %572 = vmatpush.msrb.mxu0 %v425_v14  ;;  %v593_v9 = vpop.permute.xlu1 %592 }
  0xaa   : > { %515 = vmatpush.msra.mxu1 %v1115_v6  ;;  %535 = vmatpush.msra.mxu2 %v1126_v10  ;;  %v478_v19 = vpop.permute.xlu0 %477 }
  0xab   : > { %573 = vmatpush.msrb.mxu0 %v412_v12  ;;  %559 = vmatpush.msra.mxu3 %v1115_v6  ;;  %v317_v6 = vsel %vm315_vm2, %v954_v57, %v918_v35 }
  0xac   : > { %516 = vmatpush.msra.mxu1 %v373_v15  ;;  %536 = vmatpush.msra.mxu2 %v1172_v30 }
  0xad   : > { %574 = vmatpush.msrb.mxu0 %v399_v16  ;;  %848 = vmatmul.msk.f32.vlgmr.msra.gmra.mxu3 %vm480_vm3, %v433_v18 }
  0xae   : > { %845 = vmatmul.msk.f32.vlgmr.msra.gmra.mxu0 %vm480_vm3, %v433_v18  ;;  %517 = vmatpush.msra.mxu1 %v345_v17 }
  0xaf   : > { %537 = vmatpush.msra.mxu2 %v1191_v38  ;;  %575 = vmatpush.msrb.mxu0 %v290_v4 }
  0xb0   : > { %518 = vmatpush.msra.mxu1 %v317_v6 }
  0xb1   : > { %538 = vmatpush.msra.mxu2 %v1199_v40  ;;  %576 = vmatpush.msrb.mxu0 %v376_v52 }
  0xb2   : > { %519 = vmatpush.msra.mxu1 %v285_v13 }
  0xb3   : > { %539 = vmatpush.msra.mxu2 %v1113_v5  ;;  %577 = vmatpush.msrb.mxu0 %v348_v2 }
  0xb4   : > { %847 = vmatmul.msk.f32.vlgmr.msra.gmra.mxu2 %vm480_vm3, %v433_v18  ;;  %846 = vmatmul.msk.f32.vlgmr.msra.gmra.mxu1 %vm480_vm3, %v433_v18 }
  0xb5   : > { %578 = vmatpush.msrb.mxu0 %v320_v8 }
  0xb7   : > { %579 = vmatpush.msrb.mxu0 %v1126_v10 }
  0xb8   : > { %849 = vmatmul.msk.f32.vlgmr.msrb.gmra.mxu0 %vm480_vm3, %v433_v18 }
 0x12b   : > { %v501_v1 = vpop.f32.mrf.mxu0 }
 0x12c   : > { %v502_v34 = vadd.f32 %v501_v1, %v478_v19 }
 0x12e   : > { %v595_v35 = vmul.f32 %v593_v9, %v502_v34  ;;  %vm584_vm8 = vcmp.ge.f32.partialorder %v502_v34, 0.0 }
 0x130   : > { %v561_v4 = vpop.f32.mrf.mxu3  ;;  %v600_v36 = vsel %vm584_vm8, %v502_v34, %v595_v35 }
 0x131   : > { %v521_v20 = vpop.f32.mrf.mxu1  ;;  %v562_v21 = vadd.f32 %v561_v4, %v478_v19 }
 0x132   : > { %v522_v22 = vadd.f32 %v521_v20, %v478_v19 }
 0x133   : > { %v598_v23 = vmul.f32 %v593_v9, %v562_v21  ;;  %vm587_vm4 = vcmp.ge.f32.partialorder %v562_v21, 0.0 }
 0x134   : > { %v596_v25 = vmul.f32 %v593_v9, %v522_v22  ;;  %vm585_vm6 = vcmp.ge.f32.partialorder %v522_v22, 0.0 }
 0x135   : > { %v581_v13 = vpop.f32.mrf.mxu0  ;;  %v603_v10 = vsel %vm587_vm4, %v562_v21, %v598_v23 }
 0x136   : > { %v582_v5 = vadd.f32 %v581_v13, %v478_v19  ;;  %v601_v31 = vsel %vm585_vm6, %v522_v22, %v596_v25 }
 0x137   : > { %v541_v24 = vpop.f32.mrf.mxu2 }
 0x138   : > { %vm588_vm5 = vcmp.ge.f32.partialorder %v582_v5, 0.0  ;;  %v599_v26 = vmul.f32 %v593_v9, %v582_v5  ;;  %v542_v27 = vadd.f32 %v541_v24, %v478_v19 }
 0x13a   : > { %v604_v28 = vsel %vm588_vm5, %v582_v5, %v599_v26  ;;  %vm586_vm7 = vcmp.ge.f32.partialorder %v542_v27, 0.0  ;;  %v597_v29 = vmul.f32 %v593_v9, %v542_v27 }
 0x13b   : > { %v972_v30 = vpack.i.bf16 %v604_v28, %v603_v10 }
 0x13c   : > { %v602_v32 = vsel %vm586_vm7, %v542_v27, %v597_v29 }
 0x13d   : > { %973 = vrot.lane.b32.xlu1 %v972_v30, %s1033_s13  ;;  %968 = vrot.lane.b32.xlu2 %v972_v30, %s1032_s12  ;;  %v962_v33 = vpack.i.bf16 %v601_v31, %v602_v32 }
 0x13f   : > { %963 = vrot.lane.b32.xlu0 %v962_v33, %s1032_s12 }
 0x145   : > { %978 = vrot.lane.b32.xlu1 %v962_v33, %s1033_s13  ;;  %983 = vrot.lane.b32.xlu2 %v972_v30, %s1034_s14 }
 0x147   : > { %634 = vrot.lane.b32.xlu0 %v600_v36, %s1032_s12 }
 0x14d   : > { %988 = vrot.lane.b32.xlu2 %v962_v33, %s1034_s14  ;;  %622 = vrot.lane.b32.xlu1 %v600_v36, %s1033_s13 }
 0x14f   : > { %700 = vperm.xlu0 %960, %v697_v37  }
 0x155   : > { %610 = vrot.lane.b32.xlu2 %v600_v36, %s1034_s14  ;;  %s273_s14 = scalar_lea.vmem %s1319_s6, %s842_s11 }
 0x197   : > { %v969_v38 = vpop.permute.xlu2 %968 }
 0x198   : > { %v971_v39 = vunpack.i.h.bf16 %v969_v38  ;;  %v970_v40 = vunpack.i.l.bf16 %v969_v38 }
 0x19a   : > { %v675_v41 = vsel %vm371_vm0, %v970_v40, %v971_v39 }
 0x19b   : > { %734 = vmatpush.msrb.mxu2 %v675_v41 }
 0x19f   : > { %v984_v42 = vpop.permute.xlu2 %983 }
 0x1a0   : > { %v986_v44 = vunpack.i.h.bf16 %v984_v42  ;;  %v985_v45 = vunpack.i.l.bf16 %v984_v42 }
 0x1a2   : > { %v655_v54 = vsel %vm315_vm2, %v985_v45, %v986_v44 }
 0x1a7   : > { %v989_v51 = vpop.permute.xlu2 %988 }
 0x1a8   : > { %v991_v55 = vunpack.i.h.bf16 %v989_v51  ;;  %v990_v57 = vunpack.i.l.bf16 %v989_v51 }
 0x1aa   : > { %v654_v63 = vsel %vm315_vm2, %v990_v57, %v985_v45  ;;  %v617_v0 = vsel %vm315_vm2, %v991_v55, %v990_v57 }
 0x1af   : > { %v974_v43 = vpop.permute.xlu1 %973  ;;  %v611_v11 = vpop.permute.xlu2 %610 }
 0x1b0   : > { %v976_v46 = vunpack.i.h.bf16 %v974_v43  ;;  %v975_v47 = vunpack.i.l.bf16 %v974_v43  ;;  %v616_v12 = vsel %vm315_vm2, %v611_v11, %v991_v55 }
 0x1b1   : > { %v964_v48 = vpop.permute.xlu0 %963 }
 0x1b2   : > { %v965_v49 = vunpack.i.l.bf16 %v964_v48  ;;  %v665_v50 = vsel %vm343_vm1, %v975_v47, %v976_v46  ;;  %v966_v52 = vunpack.i.h.bf16 %v964_v48 }
 0x1b3   : > { %735 = vmatpush.msrb.mxu2 %v665_v50 }
 0x1b4   : > { %v674_v53 = vsel %vm371_vm0, %v965_v49, %v970_v40  ;;  %v641_v60 = vsel %vm371_vm0, %v966_v52, %v965_v49 }
 0x1b5   : > { %714 = vmatpush.msrb.mxu1 %v674_v53  ;;  %736 = vmatpush.msrb.mxu2 %v655_v54 }
 0x1b7   : > { %v979_v56 = vpop.permute.xlu1 %978  ;;  %737 = vmatpush.msrb.mxu2 %v603_v10 }
 0x1b8   : > { %v981_v58 = vunpack.i.h.bf16 %v979_v56  ;;  %v980_v59 = vunpack.i.l.bf16 %v979_v56 }
 0x1b9   : > { %738 = vmatpush.msrb.mxu2 %v641_v60  ;;  %v635_v2 = vpop.permute.xlu0 %634 }
 0x1ba   : > { %v664_v61 = vsel %vm343_vm1, %v980_v59, %v975_v47  ;;  %v629_v62 = vsel %vm343_vm1, %v981_v58, %v980_v59  ;;  %v640_v8 = vsel %vm371_vm0, %v635_v2, %v966_v52 }
 0x1bb   : > { %715 = vmatpush.msrb.mxu1 %v664_v61  ;;  %739 = vmatpush.msrb.mxu2 %v629_v62 }
 0x1bd   : > { %716 = vmatpush.msrb.mxu1 %v654_v63  ;;  %740 = vmatpush.msrb.mxu2 %v617_v0 }
 0x1bf   : > { %717 = vmatpush.msrb.mxu1 %v602_v32  ;;  %741 = vmatpush.msrb.mxu2 %v601_v31  ;;  %v623_v7 = vpop.permute.xlu1 %622 }
 0x1c0   : > { %851 = vmatmul.msk.f32.vlgmr.msrb.gmra.mxu2 %vm480_vm3, %v680_v3  ;;  %v628_v14 = vsel %vm343_vm1, %v623_v7, %v981_v58 }
 0x1c1   : > { %718 = vmatpush.msrb.mxu1 %v640_v8  ;;  %v701_v15 = vpop.permute.xlu0 %700 }
 0x1c3   : > { %719 = vmatpush.msrb.mxu1 %v628_v14 }
 0x1c5   : > { %720 = vmatpush.msrb.mxu1 %v616_v12 }
 0x1c7   : > { %721 = vmatpush.msrb.mxu1 %v600_v36 }
 0x1c8   : > { %850 = vmatmul.msk.f32.vlgmr.msrb.gmra.mxu1 %vm480_vm3, %v680_v3 }
 0x243   : > { %v743_v18 = vpop.f32.mrf.mxu2 }
 0x244   : > { %v744_v16 = vadd.f32 %v743_v18, %v701_v15 }
 0x245   : > { %v723_v17 = vpop.f32.mrf.mxu1 }
 0x246   : > { %747 = vst [vmem:[%s273_s14 + $0x8] sm:$0xff] %v744_v16  ;;  %v724_v6 = vadd.f32 %v723_v17, %v701_v15 }
 0x248   : > { %746 = vst [vmem:[%s273_s14] sm:$0xff] %v724_v6 }
 0x249 PF: > { %s16_s25 = sadd.s32 1, %s1030_s25   ;;  %s1320_s21 = smov %s1022_s23 }
 0x24a   : > { %p13_p7 = scmp.ge.s32.totalorder %s16_s25, 16   ;;  %s1321_s22 = smov %s1026_s24 }
 0x24b   : > { %s1322_s23 = smov %s1325_s26  ;;  %s1323_s24 = smov %s1329_s27 }
 0x24c   :  { %15 = sbr.rel (!%p13_p7) target bundleno = 3 (0x3), region = 75 }

</bundles_post_ra>
